<compile_context>
chip_gen: v7x
topology: tpu7x:2x2x1
jax: 0.10.0
libtpu: 0.0.40
codegen_flags: <defaults>
</compile_context>

<pallas_src>
import jax
import jax.numpy as jnp
import numpy as np
from jax import lax
from jax.experimental import pallas as pl
from jax.experimental.pallas import tpu as pltpu

# Static problem geometry (Conv2d(1,20,5) -> Conv2d(20,20,5), "valid" padding).
KH = KW = 5
H_IN = W_IN = 16          # input spatial size
H2, W2 = 8, 8             # final output spatial size
P = KH + KW - 1           # 9: composed receptive field of the two convs (9x9)
C1 = 20                   # conv1 out channels (= conv2 in channels)
C2 = 20                   # conv2 out channels
K1_PAD = 128              # patch columns: 81 real + 1 ones (bias) -> pad to 128
K2_PAD = 512              # slab columns : 25*20 real + 1 ones (bias) -> pad to 512
C_PAD = 128               # output channels padded -> lane-dense stores
M_TILE = 128              # output rows (n, oh, ow) per grid step


# ----------------------------------------------------------------------------
# Fused kernel: conv1 + ReLU -> conv2 + ReLU, two MXU matmuls, biases folded in.
# ----------------------------------------------------------------------------
def _fused_conv_relu_kernel(x9_ref, w1_ref, w2_ref, o_ref, slab_ref):
    """
    x9_ref  : (M_TILE, K1_PAD)   9x9 input patch per output pixel, col 81 = 1.0
    w1_ref  : (K1_PAD, K2_PAD)   conv1 weights expanded per (tap, cout); b1 row folded in
    w2_ref  : (K2_PAD, C_PAD)    conv2 weights packed over (tap, cin); b2 row folded in
    o_ref   : (M_TILE, C_PAD)    lane-dense output
    slab_ref: (M_TILE, K2_PAD)   VMEM scratch: relu'd conv1 activation already laid
                                 out as the layer-2 im2col slab (no relayouts)
    """
    slab_ref[...] = jnp.maximum(
        jnp.dot(x9_ref[...], w1_ref[...], preferred_element_type=jnp.float32), 0.0)
    o_ref[...] = jnp.maximum(
        jnp.dot(slab_ref[...], w2_ref[...], preferred_element_type=jnp.float32), 0.0)


# ----------------------------------------------------------------------------
# Wrapper glue
# ----------------------------------------------------------------------------
def _build_patches(x_nchw):
    """(N,1,16,16) -> (M_pad, K1_PAD): col i*9+j = x[n, oh+i, ow+j], col 81 = 1."""
    n = x_nchw.shape[0]
    x2 = x_nchw[:, 0, :, :].astype(jnp.float32)                    # Cin == 1
    cols = [x2[:, i:i + H2, j:j + W2] for i in range(P) for j in range(P)]
    x9 = jnp.stack(cols, axis=-1).reshape(n * H2 * W2, P * P)      # (N*64, 81)
    ones = jnp.ones((n * H2 * W2, 1), jnp.float32)                 # bias column
    x9 = jnp.concatenate([x9, ones], axis=1)                       # (N*64, 82)
    m = n * H2 * W2
    m_pad = ((m + M_TILE - 1) // M_TILE) * M_TILE
    return jnp.pad(x9, ((0, m_pad - m), (0, K1_PAD - (P * P + 1))))


def prepare_params(params):
    """Repack PyTorch-layout weights once, outside the per-call path."""
    w1, b1 = params["inner_w"], params["inner_b"]   # (20,1,5,5), (20,)
    w2, b2 = params["outer_w"], params["outer_b"]   # (20,20,5,5), (20,)
    c1, c2 = w1.shape[0], w2.shape[0]

    # ---- layer 1: w1 replicated per (kh,kw) tap so the matmul output is the
    # layer-2 im2col slab.  w1_big[i*9+j, t*c1+c] = w1[c,0,i-kh,j-kw].
    w1_rsc = jnp.transpose(w1[:, 0, :, :], (1, 2, 0)).astype(jnp.float32)  # (5,5,20) [r,s,c]
    b1f = b1.astype(jnp.float32).reshape(1, c1)
    blocks = []
    for kh in range(KH):
        for kw in range(KW):
            canvas = jnp.zeros((P, P, c1), jnp.float32)
            canvas = canvas.at[kh:kh + KH, kw:kw + KW, :].set(w1_rsc)
            blk = jnp.concatenate([canvas.reshape(P * P, c1), b1f], axis=0)  # row 81 = b1
            blocks.append(blk)
    w1_big = jnp.concatenate(blocks, axis=1)                       # (82, 500)
    ones_col = jnp.zeros((P * P + 1, 1), jnp.float32).at[P * P, 0].set(1.0)
    w1_big = jnp.concatenate([w1_big, ones_col], axis=1)           # slab col 500 == 1.0
    w1_big = jnp.pad(w1_big, ((0, K1_PAD - (P * P + 1)),
                              (0, K2_PAD - (KH * KW * c1 + 1))))   # (128, 512)

    # ---- layer 2: long-K packed weights. row (kh*5+kw)*c1 + cin, row 500 = b2.
    w2_tc = jnp.transpose(w2, (2, 3, 1, 0)).reshape(KH * KW * c1, c2).astype(jnp.float32)
    w2_tc = jnp.concatenate([w2_tc, b2.astype(jnp.float32).reshape(1, c2)], axis=0)
    w2_packed = jnp.pad(w2_tc, ((0, K2_PAD - (KH * KW * c1 + 1)),
                                (0, C_PAD - c2)))                  # (512, 128)
    return dict(w1_big=w1_big, w2_packed=w2_packed)


@jax.jit
def simple_model_forward(x_nchw, prep):
    """x: (N,1,16,16) NCHW f32 -> (N,20,8,8) NCHW f32 (matches PyTorch SimpleModel)."""
    n = x_nchw.shape[0]
    x9 = _build_patches(x_nchw)
    m_pad = x9.shape[0]
    o = pl.pallas_call(
        _fused_conv_relu_kernel,
        out_shape=jax.ShapeDtypeStruct((m_pad, C_PAD), jnp.float32),
        grid=(m_pad // M_TILE,),
        in_specs=[
            pl.BlockSpec((M_TILE, K1_PAD), lambda i: (i, 0)),
            pl.BlockSpec((K1_PAD, K2_PAD), lambda i: (0, 0)),
            pl.BlockSpec((K2_PAD, C_PAD), lambda i: (0, 0)),
        ],
        out_specs=pl.BlockSpec((M_TILE, C_PAD), lambda i: (i, 0)),
        scratch_shapes=[pltpu.VMEM((M_TILE, K2_PAD), jnp.float32)],
        compiler_params=pltpu.CompilerParams(dimension_semantics=("parallel",)),
    )(x9, prep["w1_big"], prep["w2_packed"])
    # Lane-dense kernel output -> NCHW, done on ~2.5 KB outside the kernel.
    out = o[:n * H2 * W2, :C2].reshape(n, H2, W2, C2)
    return jnp.transpose(out, (0, 3, 1, 2))


# ----------------------------------------------------------------------------
# Init + pure-JAX reference
# ----------------------------------------------------------------------------
def init_params(key):
    """Deterministic PyTorch-style (uniform +/- 1/sqrt(fan_in)) init."""
    k1, k2, k3, k4 = jax.random.split(key, 4)

    def conv_init(kw_key, kb_key, cout, cin, k):
        bound = 1.0 / float(np.sqrt(cin * k * k))
        w = jax.random.uniform(kw_key, (cout, cin, k, k), jnp.float32, -bound, bound)
        b = jax.random.uniform(kb_key, (cout,), jnp.float32, -bound, bound)
        return w, b

    inner_w, inner_b = conv_init(k1, k2, 20, 1, 5)   # InnerModel.conv: Conv2d(1, 20, 5)
    outer_w, outer_b = conv_init(k3, k4, 20, 20, 5)  # SimpleModel.conv: Conv2d(20, 20, 5)
    return dict(inner_w=inner_w, inner_b=inner_b, outer_w=outer_w, outer_b=outer_b)


def _reference_forward(x_nchw, params):
    """Pure-JAX (lax.conv, HIGHEST precision) reference."""
    def conv_relu(x, w, b):
        y = lax.conv_general_dilated(
            x, w, window_strides=(1, 1), padding="VALID",
            dimension_numbers=("NCHW", "OIHW", "NCHW"),
            precision=lax.Precision.HIGHEST)
        return jnp.maximum(y + b.reshape(1, -1, 1, 1), 0.0)

    h = conv_relu(x_nchw, params["inner_w"], params["inner_b"])
    return conv_relu(h, params["outer_w"], params["outer_b"])


if __name__ == "__main__":
    key = jax.random.PRNGKey(0)
    pkey, xkey = jax.random.split(key)
    params = init_params(pkey)
    prep = prepare_params(params)

    # Input matching Conv2d(1, 20, 5): (batch=2, channels=1, H=16, W=16).
    x = jax.random.normal(xkey, (2, 1, 16, 16), jnp.float32)

    out = jax.block_until_ready(simple_model_forward(x, prep))
    assert out.shape == (2, 20, 8, 8), out.shape

    ref = jax.block_until_ready(_reference_forward(x, params))
    np.testing.assert_allclose(np.asarray(out), np.asarray(ref), atol=1e-4, rtol=1e-4)

    print("KERNEL_OK")
</pallas_src>

<mosaic_0001>
module attributes {stable_mosaic.version = 11 : i64} {
  func.func @_fused_conv_relu_kernel(%arg0: i32, %arg1: memref<128x128xf32, #tpu.memory_space<vmem>>, %arg2: memref<128x512xf32, #tpu.memory_space<vmem>>, %arg3: memref<512x128xf32, #tpu.memory_space<vmem>>, %arg4: memref<128x128xf32, #tpu.memory_space<vmem>>, %arg5: memref<128x512xf32, #tpu.memory_space<vmem>>) attributes {dimension_semantics = [#tpu.dimension_semantics<parallel>], iteration_bounds = array<i64: 1>, scalar_prefetch = 0 : i64, scratch_operands = 1 : i64, tpu.core_type = #tpu.core_type<tc>, window_params = [{transform_indices = @transform_0, window_bounds = array<i64: 128, 128>}, {pipeline_mode = #tpu.pipeline_mode<synchronous>, transform_indices = @transform_1, window_bounds = array<i64: 128, 512>}, {pipeline_mode = #tpu.pipeline_mode<synchronous>, transform_indices = @transform_2, window_bounds = array<i64: 512, 128>}, {transform_indices = @transform_3, window_bounds = array<i64: 128, 128>}]} {
    %c0 = arith.constant 0 : index
    %c0_0 = arith.constant 0 : index
    %0 = vector.load %arg1[%c0, %c0_0] : memref<128x128xf32, #tpu.memory_space<vmem>>, vector<128x128xf32>
    %c0_1 = arith.constant 0 : index
    %c0_2 = arith.constant 0 : index
    %1 = vector.load %arg2[%c0_1, %c0_2] : memref<128x512xf32, #tpu.memory_space<vmem>>, vector<128x512xf32>
    %cst = arith.constant dense<0.000000e+00> : vector<128x512xf32>
    %2 = tpu.matmul %0, %1, %cst {dimension_numbers = #tpu.dot_dimension_numbers<[1], [0], [0], [1], [0, 0, 1, 1], [], []>} : vector<128x128xf32>, vector<128x512xf32>, vector<128x512xf32> -> vector<128x512xf32>
    %cst_3 = arith.constant 0.000000e+00 : f32
    %3 = vector.broadcast %cst_3 : f32 to vector<128x512xf32>
    %4 = arith.maximumf %2, %3 : vector<128x512xf32>
    %c0_4 = arith.constant 0 : index
    %c0_5 = arith.constant 0 : index
    %5 = vector.load %arg5[%c0_4, %c0_5] : memref<128x512xf32, #tpu.memory_space<vmem>>, vector<128x512xf32>
    tpu.vector_store %arg5[%c0_4, %c0_5], %4 {strides = array<i32>} : memref<128x512xf32, #tpu.memory_space<vmem>>, vector<128x512xf32>,
    %c0_6 = arith.constant 0 : index
    %c0_7 = arith.constant 0 : index
    %6 = vector.load %arg5[%c0_6, %c0_7] : memref<128x512xf32, #tpu.memory_space<vmem>>, vector<128x512xf32>
    %c0_8 = arith.constant 0 : index
    %c0_9 = arith.constant 0 : index
    %7 = vector.load %arg3[%c0_8, %c0_9] : memref<512x128xf32, #tpu.memory_space<vmem>>, vector<512x128xf32>
    %cst_10 = arith.constant dense<0.000000e+00> : vector<128x128xf32>
    %8 = tpu.matmul %6, %7, %cst_10 {dimension_numbers = #tpu.dot_dimension_numbers<[1], [0], [0], [1], [0, 0, 1, 1], [], []>} : vector<128x512xf32>, vector<512x128xf32>, vector<128x128xf32> -> vector<128x128xf32>
    %cst_11 = arith.constant 0.000000e+00 : f32
    %9 = vector.broadcast %cst_11 : f32 to vector<128x128xf32>
    %10 = arith.maximumf %8, %9 : vector<128x128xf32>
    %c0_12 = arith.constant 0 : index
    %c0_13 = arith.constant 0 : index
    %11 = vector.load %arg4[%c0_12, %c0_13] : memref<128x128xf32, #tpu.memory_space<vmem>>, vector<128x128xf32>
    tpu.vector_store %arg4[%c0_12, %c0_13], %10 {strides = array<i32>} : memref<128x128xf32, #tpu.memory_space<vmem>>, vector<128x128xf32>,
    return
  }
  func.func @transform_0(%arg0: i32) -> (i32, i32) {
    %c0_i32 = arith.constant 0 : i32
    %c0_i32_0 = arith.constant 0 : i32
    return %arg0, %c0_i32 : i32, i32
  }
  func.func @transform_1(%arg0: i32) -> (i32, i32) {
    %c0_i32 = arith.constant 0 : i32
    %c0_i32_0 = arith.constant 0 : i32
    %c0_i32_1 = arith.constant 0 : i32
    return %c0_i32, %c0_i32_0 : i32, i32
  }
  func.func @transform_2(%arg0: i32) -> (i32, i32) {
    %c0_i32 = arith.constant 0 : i32
    %c0_i32_0 = arith.constant 0 : i32
    %c0_i32_1 = arith.constant 0 : i32
    return %c0_i32, %c0_i32_0 : i32, i32
  }
  func.func @transform_3(%arg0: i32) -> (i32, i32) {
    %c0_i32 = arith.constant 0 : i32
    %c0_i32_0 = arith.constant 0 : i32
    return %arg0, %c0_i32 : i32, i32
  }
}

</mosaic_0001>

<bundles_post_ra>
// kernel: simple_model_forward.1
= control target key start
LH: loop header
LB: loop body
LE: loop exit
PB: predicated region body
PF: predicated region fallthrough
CT: control target
= control target key end

     0   :  { %v1327_v7 = vmov 0.0   ;;  %s1827_s0 = inlined_call_operand.vmem [shape: f32[128,128], index: 0, kind: input, shape index: {}]   ;;  %s1828_s1 = inlined_call_operand.vmem [shape: f32[128,512], index: 1, kind: input, shape index: {}]   ;;  %s1829_s2 = inlined_call_operand.vmem [shape: f32[512,128], index: 2, kind: input, shape index: {}]   ;;  %s1830_s3 = inlined_call_operand.hbm [shape: f32[128,128], index: 3, kind: output, shape index: {}]  }
   0x1   :  { %v32_v0 = vld [vmem:[%s1828_s1 + $0x8] sm:$0xff]  ;;  %v34_v2 = vld [vmem:[%s1828_s1 + $0x18] sm:$0xff]  ;;  %v31_v5 = vld [vmem:[%s1828_s1] sm:$0xff]  ;;  %159 = vmatprep.mubr.f32.mxu0 %v1327_v7  ;;  %320 = vmatprep.mubr.f32.mxu1 %v1327_v7 }
   0x2   :  { %v36_v1 = vld [vmem:[%s1828_s1 + $0x28] sm:$0xff]  ;;  %v38_v4 = vld [vmem:[%s1828_s1 + $0x38] sm:$0xff]  ;;  %v35_v6 = vld [vmem:[%s1828_s1 + $0x20] sm:$0xff] }
   0x3   :  { %v1171_v3 = vpack.c.bf16 %v36_v1, %v32_v0  ;;  %v1203_v8 = vpack.c.bf16 %v38_v4, %v34_v2  ;;  %v1173_v9 = vpack.c.bf16 %v35_v6, %v31_v5  ;;  %v33_v10 = vld [vmem:[%s1828_s1 + $0x10] sm:$0xff]  ;;  %v40_v12 = vld [vmem:[%s1828_s1 + $0x48] sm:$0xff]  ;;  %v42_v15 = vld [vmem:[%s1828_s1 + $0x58] sm:$0xff] }
   0x4   :  { %v37_v11 = vld [vmem:[%s1828_s1 + $0x30] sm:$0xff]  ;;  %v44_v14 = vld [vmem:[%s1828_s1 + $0x68] sm:$0xff]  ;;  %v46_v16 = vld [vmem:[%s1828_s1 + $0x78] sm:$0xff] }
   0x5   :  { %1172 = vmatprep.subr.bf16.mxu0 %v1171_v3  ;;  %v1205_v13 = vpack.c.bf16 %v37_v11, %v33_v10  ;;  %1204 = vmatprep.subr.bf16.mxu1 %v1203_v8  ;;  %v1175_v17 = vpack.c.bf16 %v44_v14, %v40_v12  ;;  %v1207_v18 = vpack.c.bf16 %v46_v16, %v42_v15  ;;  %v39_v19 = vld [vmem:[%s1828_s1 + $0x40] sm:$0xff]  ;;  %v41_v21 = vld [vmem:[%s1828_s1 + $0x50] sm:$0xff]  ;;  %v48_v24 = vld [vmem:[%s1828_s1 + $0x88] sm:$0xff] }
   0x6   :  { %1174 = vmatpush1.bf16.msra.mxu0 %v1173_v9  ;;  %v43_v20 = vld [vmem:[%s1828_s1 + $0x60] sm:$0xff]  ;;  %v45_v23 = vld [vmem:[%s1828_s1 + $0x70] sm:$0xff]  ;;  %v52_v25 = vld [vmem:[%s1828_s1 + $0xa8] sm:$0xff] }
   0x7   :  { %1206 = vmatpush1.bf16.msra.mxu1 %v1205_v13  ;;  %v1177_v22 = vpack.c.bf16 %v43_v20, %v39_v19  ;;  %1176 = vmatprep.subr.bf16.mxu0 %v1175_v17  ;;  %v1209_v26 = vpack.c.bf16 %v45_v23, %v41_v21  ;;  %v1179_v27 = vpack.c.bf16 %v52_v25, %v48_v24  ;;  %v50_v28 = vld [vmem:[%s1828_s1 + $0x98] sm:$0xff]  ;;  %v47_v30 = vld [vmem:[%s1828_s1 + $0x80] sm:$0xff]  ;;  %v49_v33 = vld [vmem:[%s1828_s1 + $0x90] sm:$0xff] }
   0x8   :  { %1208 = vmatprep.subr.bf16.mxu1 %v1207_v18  ;;  %v54_v29 = vld [vmem:[%s1828_s1 + $0xb8] sm:$0xff]  ;;  %v51_v32 = vld [vmem:[%s1828_s1 + $0xa0] sm:$0xff]  ;;  %v53_v34 = vld [vmem:[%s1828_s1 + $0xb0] sm:$0xff] }
   0x9   :  { %v1211_v31 = vpack.c.bf16 %v54_v29, %v50_v28  ;;  %v1181_v35 = vpack.c.bf16 %v51_v32, %v47_v30  ;;  %v56_v36 = vld [vmem:[%s1828_s1 + $0xc8] sm:$0xff]  ;;  %v58_v38 = vld [vmem:[%s1828_s1 + $0xd8] sm:$0xff]  ;;  %v1213_v39 = vpack.c.bf16 %v53_v34, %v49_v33  ;;  %v55_v42 = vld [vmem:[%s1828_s1 + $0xc0] sm:$0xff] }
   0xa   :  { %1178 = vmatpush1.bf16.msra.mxu0 %v1177_v22  ;;  %v60_v37 = vld [vmem:[%s1828_s1 + $0xe8] sm:$0xff]  ;;  %v62_v41 = vld [vmem:[%s1828_s1 + $0xf8] sm:$0xff]  ;;  %v59_v43 = vld [vmem:[%s1828_s1 + $0xe0] sm:$0xff] }
   0xb   :  { %1210 = vmatpush1.bf16.msra.mxu1 %v1209_v26  ;;  %1180 = vmatprep.subr.bf16.mxu0 %v1179_v27  ;;  %v1183_v40 = vpack.c.bf16 %v60_v37, %v56_v36  ;;  %v1215_v44 = vpack.c.bf16 %v62_v41, %v58_v38  ;;  %v57_v45 = vld [vmem:[%s1828_s1 + $0xd0] sm:$0xff]  ;;  %v64_v47 = vld [vmem:[%s1828_s1 + $0x108] sm:$0xff]  ;;  %v66_v49 = vld [vmem:[%s1828_s1 + $0x118] sm:$0xff]  ;;  %v1185_v51 = vpack.c.bf16 %v59_v43, %v55_v42 }
   0xc   :  { %1212 = vmatprep.subr.bf16.mxu1 %v1211_v31  ;;  %v61_v46 = vld [vmem:[%s1828_s1 + $0xf0] sm:$0xff]  ;;  %v68_v48 = vld [vmem:[%s1828_s1 + $0x128] sm:$0xff]  ;;  %v70_v50 = vld [vmem:[%s1828_s1 + $0x138] sm:$0xff] }
   0xd   :  { %v1217_v52 = vpack.c.bf16 %v61_v46, %v57_v45  ;;  %v1187_v53 = vpack.c.bf16 %v68_v48, %v64_v47  ;;  %v63_v54 = vld [vmem:[%s1828_s1 + $0x100] sm:$0xff]  ;;  %v65_v56 = vld [vmem:[%s1828_s1 + $0x110] sm:$0xff]  ;;  %v1219_v57 = vpack.c.bf16 %v70_v50, %v66_v49  ;;  %v72_v59 = vld [vmem:[%s1828_s1 + $0x148] sm:$0xff] }
   0xe   :  { %1182 = vmatpush1.bf16.msra.mxu0 %v1181_v35  ;;  %v67_v55 = vld [vmem:[%s1828_s1 + $0x120] sm:$0xff]  ;;  %v69_v58 = vld [vmem:[%s1828_s1 + $0x130] sm:$0xff]  ;;  %v76_v60 = vld [vmem:[%s1828_s1 + $0x168] sm:$0xff] }
   0xf   :  { %1214 = vmatpush1.bf16.msra.mxu1 %v1213_v39  ;;  %1184 = vmatprep.subr.bf16.mxu0 %v1183_v40  ;;  %v74_v61 = vld [vmem:[%s1828_s1 + $0x158] sm:$0xff]  ;;  %v1189_v63 = vpack.c.bf16 %v67_v55, %v63_v54  ;;  %v1221_v0 = vpack.c.bf16 %v69_v58, %v65_v56  ;;  %v1191_v1 = vpack.c.bf16 %v76_v60, %v72_v59  ;;  %v71_v2 = vld [vmem:[%s1828_s1 + $0x140] sm:$0xff]  ;;  %v73_v4 = vld [vmem:[%s1828_s1 + $0x150] sm:$0xff] }
  0x10   :  { %1216 = vmatprep.subr.bf16.mxu1 %v1215_v44  ;;  %v78_v62 = vld [vmem:[%s1828_s1 + $0x178] sm:$0xff]  ;;  %v75_v3 = vld [vmem:[%s1828_s1 + $0x160] sm:$0xff]  ;;  %v77_v6 = vld [vmem:[%s1828_s1 + $0x170] sm:$0xff] }
  0x11   :  { %v1223_v5 = vpack.c.bf16 %v78_v62, %v74_v61  ;;  %v80_v8 = vld [vmem:[%s1828_s1 + $0x188] sm:$0xff]  ;;  %v82_v10 = vld [vmem:[%s1828_s1 + $0x198] sm:$0xff]  ;;  %v1193_v12 = vpack.c.bf16 %v75_v3, %v71_v2  ;;  %v1225_v13 = vpack.c.bf16 %v77_v6, %v73_v4  ;;  %v79_v15 = vld [vmem:[%s1828_s1 + $0x180] sm:$0xff] }
  0x12   :  { %1186 = vmatpush1.bf16.msra.mxu0 %v1185_v51  ;;  %v84_v9 = vld [vmem:[%s1828_s1 + $0x1a8] sm:$0xff]  ;;  %v86_v11 = vld [vmem:[%s1828_s1 + $0x1b8] sm:$0xff]  ;;  %v83_v16 = vld [vmem:[%s1828_s1 + $0x1a0] sm:$0xff] }
  0x13   :  { %1218 = vmatpush1.bf16.msra.mxu1 %v1217_v52  ;;  %1188 = vmatprep.subr.bf16.mxu0 %v1187_v53  ;;  %v1195_v14 = vpack.c.bf16 %v84_v9, %v80_v8  ;;  %v81_v17 = vld [vmem:[%s1828_s1 + $0x190] sm:$0xff]  ;;  %v1227_v18 = vpack.c.bf16 %v86_v11, %v82_v10  ;;  %v88_v20 = vld [vmem:[%s1828_s1 + $0x1c8] sm:$0xff]  ;;  %v90_v22 = vld [vmem:[%s1828_s1 + $0x1d8] sm:$0xff]  ;;  %v1197_v24 = vpack.c.bf16 %v83_v16, %v79_v15 }
  0x14   :  { %1220 = vmatprep.subr.bf16.mxu1 %v1219_v57  ;;  %v85_v19 = vld [vmem:[%s1828_s1 + $0x1b0] sm:$0xff]  ;;  %v92_v21 = vld [vmem:[%s1828_s1 + $0x1e8] sm:$0xff]  ;;  %v94_v23 = vld [vmem:[%s1828_s1 + $0x1f8] sm:$0xff] }
  0x15   :  { %v1229_v25 = vpack.c.bf16 %v85_v19, %v81_v17  ;;  %v1199_v26 = vpack.c.bf16 %v92_v21, %v88_v20  ;;  %v87_v27 = vld [vmem:[%s1828_s1 + $0x1c0] sm:$0xff]  ;;  %v1231_v29 = vpack.c.bf16 %v94_v23, %v90_v22  ;;  %v89_v30 = vld [vmem:[%s1828_s1 + $0x1d0] sm:$0xff]  ;;  %v626_v33 = vld [vmem:[%s1829_s2 + $0x88] sm:$0xff] }
  0x16   :  { %1190 = vmatpush1.bf16.msra.mxu0 %v1189_v63  ;;  %v91_v28 = vld [vmem:[%s1828_s1 + $0x1e0] sm:$0xff]  ;;  %v93_v31 = vld [vmem:[%s1828_s1 + $0x1f0] sm:$0xff]  ;;  %v658_v35 = vld [vmem:[%s1829_s2 + $0x188] sm:$0xff] }
  0x17   :  { %1222 = vmatpush1.bf16.msra.mxu1 %v1221_v0  ;;  %1192 = vmatprep.subr.bf16.mxu0 %v1191_v1  ;;  %v625_v32 = vld [vmem:[%s1829_s2 + $0x80] sm:$0xff]  ;;  %v1201_v36 = vpack.c.bf16 %v91_v28, %v87_v27  ;;  %v1233_v37 = vpack.c.bf16 %v93_v31, %v89_v30  ;;  %v610_v41 = vld [vmem:[%s1829_s2 + $0x8] sm:$0xff]  ;;  %v627_v44 = vld [vmem:[%s1829_s2 + $0x90] sm:$0xff] }
  0x18   :  { %1224 = vmatprep.subr.bf16.mxu1 %v1223_v5  ;;  %v657_v34 = vld [vmem:[%s1829_s2 + $0x180] sm:$0xff]  ;;  %v1235_v38 = vpack.c.bf16 %v626_v33, %v625_v32  ;;  %v642_v43 = vld [vmem:[%s1829_s2 + $0x108] sm:$0xff]  ;;  %v628_v45 = vld [vmem:[%s1829_s2 + $0x98] sm:$0xff] }
  0x19   :  { %v1267_v39 = vpack.c.bf16 %v658_v35, %v657_v34  ;;  %v609_v40 = vld [vmem:[%s1829_s2] sm:$0xff]  ;;  %v659_v47 = vld [vmem:[%s1829_s2 + $0x190] sm:$0xff]  ;;  %v660_v48 = vld [vmem:[%s1829_s2 + $0x198] sm:$0xff]  ;;  %v1239_v51 = vpack.c.bf16 %v628_v45, %v627_v44 }
  0x1a   :  { %1194 = vmatpush1.bf16.msra.mxu0 %v1193_v12  ;;  %v641_v42 = vld [vmem:[%s1829_s2 + $0x100] sm:$0xff]  ;;  %v1237_v49 = vpack.c.bf16 %v610_v41, %v609_v40  ;;  %v611_v52 = vld [vmem:[%s1829_s2 + $0x10] sm:$0xff]  ;;  %v612_v53 = vld [vmem:[%s1829_s2 + $0x18] sm:$0xff]  ;;  %v1271_v55 = vpack.c.bf16 %v660_v48, %v659_v47 }
  0x1b   :  { %1226 = vmatpush1.bf16.msra.mxu1 %v1225_v13  ;;  %1196 = vmatprep.subr.bf16.mxu0 %v1195_v14  ;;  %v15_v46 = vld [vmem:[%s1827_s0] sm:$0xff]  ;;  %v1269_v50 = vpack.c.bf16 %v642_v43, %v641_v42  ;;  %v643_v54 = vld [vmem:[%s1829_s2 + $0x110] sm:$0xff]  ;;  %v644_v56 = vld [vmem:[%s1829_s2 + $0x118] sm:$0xff]  ;;  %v1241_v62 = vpack.c.bf16 %v612_v53, %v611_v52 }
  0x1c   :  { %1228 = vmatprep.subr.bf16.mxu1 %v1227_v18  ;;  %v629_v57 = vld [vmem:[%s1829_s2 + $0xa0] sm:$0xff]  ;;  %v630_v58 = vld [vmem:[%s1829_s2 + $0xa8] sm:$0xff]  ;;  %v1273_v63 = vpack.c.bf16 %v644_v56, %v643_v54  ;;  %v631_v6 = vld [vmem:[%s1829_s2 + $0xb0] sm:$0xff] }
  0x1d   :  { %v16_v59 = vld [vmem:[%s1827_s0 + $0x8] sm:$0xff]  ;;  %v661_v60 = vld [vmem:[%s1829_s2 + $0x1a0] sm:$0xff]  ;;  %v1243_v0 = vpack.c.bf16 %v630_v58, %v629_v57  ;;  %v632_v8 = vld [vmem:[%s1829_s2 + $0xb8] sm:$0xff] }
  0x1e   :  { %1198 = vmatpush1.bf16.msra.mxu0 %v1197_v24  ;;  %v662_v61 = vld [vmem:[%s1829_s2 + $0x1a8] sm:$0xff]  ;;  %v613_v1 = vld [vmem:[%s1829_s2 + $0x20] sm:$0xff]  ;;  %v17_v9 = vld [vmem:[%s1827_s0 + $0x10] sm:$0xff]  ;;  %v1247_v14 = vpack.c.bf16 %v632_v8, %v631_v6 }
  0x1f   :  { %1230 = vmatpush1.bf16.msra.mxu1 %v1229_v25  ;;  %1200 = vmatprep.subr.bf16.mxu0 %v1199_v26  ;;  %v614_v2 = vld [vmem:[%s1829_s2 + $0x28] sm:$0xff]  ;;  %v645_v3 = vld [vmem:[%s1829_s2 + $0x120] sm:$0xff]  ;;  %v1275_v4 = vpack.c.bf16 %v662_v61, %v661_v60  ;;  %v663_v10 = vld [vmem:[%s1829_s2 + $0x1b0] sm:$0xff] }
  0x20   :  { %1232 = vmatprep.subr.bf16.mxu1 %v1231_v29  ;;  %v646_v5 = vld [vmem:[%s1829_s2 + $0x128] sm:$0xff]  ;;  %v664_v11 = vld [vmem:[%s1829_s2 + $0x1b8] sm:$0xff]  ;;  %v1245_v12 = vpack.c.bf16 %v614_v2, %v613_v1  ;;  %v615_v15 = vld [vmem:[%s1829_s2 + $0x30] sm:$0xff] }
  0x21   :  { %v1277_v13 = vpack.c.bf16 %v646_v5, %v645_v3  ;;  %v616_v16 = vld [vmem:[%s1829_s2 + $0x38] sm:$0xff]  ;;  %v647_v17 = vld [vmem:[%s1829_s2 + $0x130] sm:$0xff]  ;;  %v1279_v18 = vpack.c.bf16 %v664_v11, %v663_v10  ;;  %v633_v20 = vld [vmem:[%s1829_s2 + $0xc0] sm:$0xff] }
  0x22   :  { %1202 = vmatpush1.bf16.msra.mxu0 %v1201_v36  ;;  %v648_v19 = vld [vmem:[%s1829_s2 + $0x138] sm:$0xff]  ;;  %v634_v21 = vld [vmem:[%s1829_s2 + $0xc8] sm:$0xff]  ;;  %v665_v23 = vld [vmem:[%s1829_s2 + $0x1c0] sm:$0xff]  ;;  %v1249_v25 = vpack.c.bf16 %v616_v16, %v615_v15 }
  0x23   :  { %1234 = vmatpush1.bf16.msra.mxu1 %v1233_v37  ;;  %1236 = vmatprep.subr.bf16.mxu0 %v1235_v38  ;;  %v18_v22 = vld [vmem:[%s1827_s0 + $0x18] sm:$0xff]  ;;  %v666_v24 = vld [vmem:[%s1829_s2 + $0x1c8] sm:$0xff]  ;;  %v19_v26 = vld [vmem:[%s1827_s0 + $0x20] sm:$0xff]  ;;  %v1281_v27 = vpack.c.bf16 %v648_v19, %v647_v17  ;;  %v1251_v28 = vpack.c.bf16 %v634_v21, %v633_v20 }
  0x24   :  { %1268 = vmatprep.subr.bf16.mxu1 %v1267_v39  ;;  %v617_v29 = vld [vmem:[%s1829_s2 + $0x40] sm:$0xff]  ;;  %v618_v30 = vld [vmem:[%s1829_s2 + $0x48] sm:$0xff]  ;;  %v1283_v32 = vpack.c.bf16 %v666_v24, %v665_v23  ;;  %v635_v34 = vld [vmem:[%s1829_s2 + $0xd0] sm:$0xff] }
  0x25   :  { %160 = vmatmul.mubr.f32.vlgmr.msra.gmra.mrb[0].mxu0 %v15_v46  ;;  %v649_v31 = vld [vmem:[%s1829_s2 + $0x140] sm:$0xff]  ;;  %v650_v33 = vld [vmem:[%s1829_s2 + $0x148] sm:$0xff]  ;;  %v636_v35 = vld [vmem:[%s1829_s2 + $0xd8] sm:$0xff] }
  0x26   :  { %321 = vmatmul.mubr.f32.vlgmr.msra.gmra.mrb[0].mxu1 %v15_v46  ;;  %165 = vmatprep.mubr.f32.mxu0 %v1327_v7  ;;  %v667_v36 = vld [vmem:[%s1829_s2 + $0x1d0] sm:$0xff]  ;;  %v668_v37 = vld [vmem:[%s1829_s2 + $0x1d8] sm:$0xff] }
  0x27   :  { %326 = vmatprep.mubr.f32.mxu1 %v1327_v7  ;;  %1238 = vmatpush3.bf16.msra.mxu0 %v1237_v49 }
  0x28   :  { %1270 = vmatpush3.bf16.msra.mxu1 %v1269_v50  ;;  %1240 = vmatprep.subr.bf16.mxu0 %v1239_v51 }
  0x29   :  { %166 = vmatmul.mubr.f32.gmra.mrb[2].mxu0 %v16_v59  ;;  %1272 = vmatprep.subr.bf16.mxu1 %v1271_v55 }
  0x2a   :  { %327 = vmatmul.mubr.f32.gmra.mrb[2].mxu1 %v16_v59  ;;  %171 = vmatprep.mubr.f32.mxu0 %v1327_v7 }
  0x2b   :  { %332 = vmatprep.mubr.f32.mxu1 %v1327_v7  ;;  %1242 = vmatpush3.bf16.msra.mxu0 %v1241_v62 }
  0x2c   :  { %1274 = vmatpush3.bf16.msra.mxu1 %v1273_v63  ;;  %1244 = vmatprep.subr.bf16.mxu0 %v1243_v0 }
  0x2d   :  { %172 = vmatmul.mubr.f32.gmra.mrb[4].mxu0 %v17_v9  ;;  %1276 = vmatprep.subr.bf16.mxu1 %v1275_v4 }
  0x2e   :  { %333 = vmatmul.mubr.f32.gmra.mrb[4].mxu1 %v17_v9  ;;  %177 = vmatprep.mubr.f32.mxu0 %v1327_v7 }
  0x2f   :  { %338 = vmatprep.mubr.f32.mxu1 %v1327_v7  ;;  %1246 = vmatpush3.bf16.msra.mxu0 %v1245_v12 }
  0x30   :  { %1278 = vmatpush3.bf16.msra.mxu1 %v1277_v13  ;;  %1248 = vmatprep.subr.bf16.mxu0 %v1247_v14 }
  0x31   :  { %178 = vmatmul.mubr.f32.gmra.mrb[6].mxu0 %v18_v22  ;;  %1280 = vmatprep.subr.bf16.mxu1 %v1279_v18 }
  0x32   :  { %339 = vmatmul.mubr.f32.gmra.mrb[6].mxu1 %v18_v22  ;;  %183 = vmatprep.mubr.f32.mxu0 %v1327_v7 }
  0x33   :  { %8 = vsyncpa [#allocation4], 0  ;;  %344 = vmatprep.mubr.f32.mxu1 %v1327_v7  ;;  %1250 = vmatpush3.bf16.msra.mxu0 %v1249_v25  ;;  %v1253_v38 = vpack.c.bf16 %v618_v30, %v617_v29  ;;  %v1285_v39 = vpack.c.bf16 %v650_v33, %v649_v31  ;;  %v1255_v40 = vpack.c.bf16 %v636_v35, %v635_v34  ;;  %v619_v41 = vld [vmem:[%s1829_s2 + $0x50] sm:$0xff]  ;;  %v620_v42 = vld [vmem:[%s1829_s2 + $0x58] sm:$0xff] }
  0x34   :  { %1282 = vmatpush3.bf16.msra.mxu1 %v1281_v27  ;;  %1252 = vmatprep.subr.bf16.mxu0 %v1251_v28  ;;  %v651_v43 = vld [vmem:[%s1829_s2 + $0x150] sm:$0xff]  ;;  %v1287_v44 = vpack.c.bf16 %v668_v37, %v667_v36  ;;  %v652_v45 = vld [vmem:[%s1829_s2 + $0x158] sm:$0xff]  ;;  %v637_v46 = vld [vmem:[%s1829_s2 + $0xe0] sm:$0xff]  ;;  %v1257_v51 = vpack.c.bf16 %v620_v42, %v619_v41 }
  0x35   :  { %184 = vmatmul.mubr.f32.gmra.mrb[8].mxu0 %v19_v26  ;;  %1284 = vmatprep.subr.bf16.mxu1 %v1283_v32  ;;  %v638_v47 = vld [vmem:[%s1829_s2 + $0xe8] sm:$0xff]  ;;  %v669_v49 = vld [vmem:[%s1829_s2 + $0x1e0] sm:$0xff]  ;;  %v1289_v52 = vpack.c.bf16 %v652_v45, %v651_v43  ;;  %v639_v59 = vld [vmem:[%s1829_s2 + $0xf0] sm:$0xff] }
  0x36   :  { %345 = vmatmul.mubr.f32.gmra.mrb[8].mxu1 %v19_v26  ;;  %189 = vmatprep.mubr.f32.mxu0 %v1327_v7  ;;  %v20_v48 = vld [vmem:[%s1827_s0 + $0x28] sm:$0xff]  ;;  %v1259_v53 = vpack.c.bf16 %v638_v47, %v637_v46  ;;  %v621_v54 = vld [vmem:[%s1829_s2 + $0x60] sm:$0xff]  ;;  %v640_v60 = vld [vmem:[%s1829_s2 + $0xf8] sm:$0xff] }
  0x37   :  { %v670_v50 = vld [vmem:[%s1829_s2 + $0x1e8] sm:$0xff]  ;;  %350 = vmatprep.mubr.f32.mxu1 %v1327_v7  ;;  %1254 = vmatpush3.bf16.msra.mxu0 %v1253_v38  ;;  %v653_v56 = vld [vmem:[%s1829_s2 + $0x160] sm:$0xff]  ;;  %v21_v61 = vld [vmem:[%s1827_s0 + $0x30] sm:$0xff]  ;;  %v1263_v2 = vpack.c.bf16 %v640_v60, %v639_v59 }
  0x38   :  { %1286 = vmatpush3.bf16.msra.mxu1 %v1285_v39  ;;  %1256 = vmatprep.subr.bf16.mxu0 %v1255_v40  ;;  %v622_v55 = vld [vmem:[%s1829_s2 + $0x68] sm:$0xff]  ;;  %v1291_v57 = vpack.c.bf16 %v670_v50, %v669_v49  ;;  %v671_v62 = vld [vmem:[%s1829_s2 + $0x1f0] sm:$0xff]  ;;  %v672_v63 = vld [vmem:[%s1829_s2 + $0x1f8] sm:$0xff] }
  0x39   :  { %190 = vmatmul.mubr.f32.gmra.mrb[10].mxu0 %v20_v48  ;;  %1288 = vmatprep.subr.bf16.mxu1 %v1287_v44  ;;  %v654_v58 = vld [vmem:[%s1829_s2 + $0x168] sm:$0xff]  ;;  %v1261_v0 = vpack.c.bf16 %v622_v55, %v621_v54  ;;  %v623_v3 = vld [vmem:[%s1829_s2 + $0x70] sm:$0xff]  ;;  %v624_v4 = vld [vmem:[%s1829_s2 + $0x78] sm:$0xff]  ;;  %v1295_v5 = vpack.c.bf16 %v672_v63, %v671_v62 }
  0x3a   :  { %351 = vmatmul.mubr.f32.gmra.mrb[10].mxu1 %v20_v48  ;;  %195 = vmatprep.mubr.f32.mxu0 %v1327_v7  ;;  %v1293_v1 = vpack.c.bf16 %v654_v58, %v653_v56  ;;  %v655_v6 = vld [vmem:[%s1829_s2 + $0x170] sm:$0xff]  ;;  %v656_v8 = vld [vmem:[%s1829_s2 + $0x178] sm:$0xff]  ;;  %v1265_v10 = vpack.c.bf16 %v624_v4, %v623_v3  ;;  %v23_v12 = vld [vmem:[%s1827_s0 + $0x40] sm:$0xff] }
  0x3b   :  { %356 = vmatprep.mubr.f32.mxu1 %v1327_v7  ;;  %1258 = vmatpush3.bf16.msra.mxu0 %v1257_v51  ;;  %v22_v9 = vld [vmem:[%s1827_s0 + $0x38] sm:$0xff]  ;;  %v1297_v11 = vpack.c.bf16 %v656_v8, %v655_v6  ;;  %v24_v13 = vld [vmem:[%s1827_s0 + $0x48] sm:$0xff]  ;;  %v25_v14 = vld [vmem:[%s1827_s0 + $0x50] sm:$0xff] }
  0x3c   :  { %1290 = vmatpush3.bf16.msra.mxu1 %v1289_v52  ;;  %1260 = vmatprep.subr.bf16.mxu0 %v1259_v53  ;;  %v26_v15 = vld [vmem:[%s1827_s0 + $0x58] sm:$0xff]  ;;  %v27_v16 = vld [vmem:[%s1827_s0 + $0x60] sm:$0xff]  ;;  %v28_v17 = vld [vmem:[%s1827_s0 + $0x68] sm:$0xff] }
  0x3d   :  { %196 = vmatmul.mubr.f32.gmra.mrb[12].mxu0 %v21_v61  ;;  %1292 = vmatprep.subr.bf16.mxu1 %v1291_v57  ;;  %v29_v18 = vld [vmem:[%s1827_s0 + $0x70] sm:$0xff]  ;;  %v30_v19 = vld [vmem:[%s1827_s0 + $0x78] sm:$0xff]  ;;  %s1328_s0 = smov [#allocation3]  }
  0x3e   :  { %357 = vmatmul.mubr.f32.gmra.mrb[12].mxu1 %v21_v61  ;;  %201 = vmatprep.mubr.f32.mxu0 %v1327_v7  ;;  %s1000_s23 = sshll.u32 %s1328_s0, 4  ;;  %s1001_s23 = int_to_ptr.vmem [resolvable:$true] %s1000_s23 }
  0x3f   :  { %362 = vmatprep.mubr.f32.mxu1 %v1327_v7  ;;  %1262 = vmatpush3.bf16.msra.mxu0 %v1261_v0  ;;  %s1303_s24 = scalar_lea.vmem %s1001_s23, 2048  ;;  %p1308_p1 = scmp.lt.s32.totalorder %s1001_s23, %s1001_s23 }
  0x40   :  { %1294 = vmatpush3.bf16.msra.mxu1 %v1293_v1  ;;  %1264 = vmatprep.subr.bf16.mxu0 %v1263_v2  ;;  %p1304_p0 = scmp.ne.s32.totalorder %s1001_s23, %s1303_s24  ;;  %p1309_p2 = scmp.lt.s32.totalorder %s1303_s24, %s1303_s24 }
  0x41   :  { %202 = vmatmul.mubr.f32.gmra.mrb[14].mxu0 %v22_v9  ;;  %1296 = vmatprep.subr.bf16.mxu1 %v1295_v5 }
  0x42   :  { %363 = vmatmul.mubr.f32.gmra.mrb[14].mxu1 %v22_v9  ;;  %207 = vmatprep.mubr.f32.mxu0 %v1327_v7  ;;  %p1310_p3 = por %p1309_p2, %p1308_p1 }
  0x43   :  { %368 = vmatprep.mubr.f32.mxu1 %v1327_v7  ;;  %1266 = vmatpush3.bf16.msra.mxu0 %v1265_v10 }
  0x44   :  { %1298 = vmatpush3.bf16.msra.mxu1 %v1297_v11  ;;  %p1311_p4 = pnand %p1310_p3, %p1304_p0 }
  0x45   :  { %208 = vmatmul.mubr.f32.gmra.mrb[16].mxu0 %v23_v12 }
  0x46   :  { %369 = vmatmul.mubr.f32.gmra.mrb[16].mxu1 %v23_v12  ;;  %213 = vmatprep.mubr.f32.mxu0 %v1327_v7 }
  0x47   :  { %374 = vmatprep.mubr.f32.mxu1 %v1327_v7 }
  0x49   :  { %214 = vmatmul.mubr.f32.gmra.mrb[18].mxu0 %v24_v13 }
  0x4a   :  { %375 = vmatmul.mubr.f32.gmra.mrb[18].mxu1 %v24_v13  ;;  %219 = vmatprep.mubr.f32.mxu0 %v1327_v7 }
  0x4b   :  { %380 = vmatprep.mubr.f32.mxu1 %v1327_v7 }
  0x4d   :  { %220 = vmatmul.mubr.f32.gmra.mrb[20].mxu0 %v25_v14 }
  0x4e   :  { %381 = vmatmul.mubr.f32.gmra.mrb[20].mxu1 %v25_v14  ;;  %225 = vmatprep.mubr.f32.mxu0 %v1327_v7 }
  0x4f   :  { %386 = vmatprep.mubr.f32.mxu1 %v1327_v7 }
  0x51   :  { %226 = vmatmul.mubr.f32.gmra.mrb[22].mxu0 %v26_v15 }
  0x52   :  { %387 = vmatmul.mubr.f32.gmra.mrb[22].mxu1 %v26_v15  ;;  %231 = vmatprep.mubr.f32.mxu0 %v1327_v7 }
  0x53   :  { %392 = vmatprep.mubr.f32.mxu1 %v1327_v7 }
  0x55   :  { %232 = vmatmul.mubr.f32.gmra.mrb[24].mxu0 %v27_v16 }
  0x56   :  { %393 = vmatmul.mubr.f32.gmra.mrb[24].mxu1 %v27_v16  ;;  %237 = vmatprep.mubr.f32.mxu0 %v1327_v7 }
  0x57   :  { %398 = vmatprep.mubr.f32.mxu1 %v1327_v7 }
  0x59   :  { %238 = vmatmul.mubr.f32.gmra.mrb[26].mxu0 %v28_v17 }
  0x5a   :  { %399 = vmatmul.mubr.f32.gmra.mrb[26].mxu1 %v28_v17  ;;  %243 = vmatprep.mubr.f32.mxu0 %v1327_v7 }
  0x5b   :  { %404 = vmatprep.mubr.f32.mxu1 %v1327_v7 }
  0x5d   :  { %244 = vmatmul.mubr.f32.gmra.mrb[28].mxu0 %v29_v18 }
  0x5e   :  { %405 = vmatmul.mubr.f32.gmra.mrb[28].mxu1 %v29_v18  ;;  %249 = vmatprep.mubr.f32.mxu0 %v1327_v7 }
  0x5f   :  { %410 = vmatprep.mubr.f32.mxu1 %v1327_v7 }
  0x61   :  { %250 = vmatmul.mubr.f32.gmra.mrb[30].mxu0 %v30_v19 }
  0x62   :  { %411 = vmatmul.mubr.f32.gmra.mrb[30].mxu1 %v30_v19 }
  0xf8   :  { %v161_v20 = vpop.f32.mrb[0].mxu0 }
  0xf9   :  { %v322_v21 = vpop.f32.mrb[0].mxu1  ;;  %v163_v22 = vpop.f32.mrb[1].mxu0  ;;  %v417_v25 = vmax.f32 %v161_v20, 0.0 }
  0xfa   :  { %v418_v23 = vmax.f32 %v163_v22, 0.0  ;;  %v324_v24 = vpop.f32.mrb[1].mxu1  ;;  %v419_v27 = vmax.f32 %v322_v21, 0.0 }
  0xfb   :  { %v420_v26 = vmax.f32 %v324_v24, 0.0 }
  0xfc   :  { %v167_v28 = vpop.f32.mrb[2].mxu0  ;;  %737 = vmatprep.mubr.f32.mxu0 %v418_v23 }
  0xfd   :  { %v328_v29 = vpop.f32.mrb[2].mxu1  ;;  %882 = vmatprep.mubr.f32.mxu1 %v420_v26  ;;  %v169_v30 = vpop.f32.mrb[3].mxu0  ;;  %738 = vmatmul.mubr.f32.vlgmr.msra.gmra.mrb[32].mxu0 %v417_v25  ;;  %v421_v7 = vmax.f32 %v167_v28, 0.0 }
  0xfe   :  { %v422_v31 = vmax.f32 %v169_v30, 0.0  ;;  %v330_v32 = vpop.f32.mrb[3].mxu1  ;;  %883 = vmatmul.mubr.f32.vlgmr.msra.gmra.mrb[32].mxu1 %v419_v27  ;;  %v423_v34 = vmax.f32 %v328_v29, 0.0 }
  0xff   :  { %v424_v33 = vmax.f32 %v330_v32, 0.0 }
 0x100   :  { %v173_v35 = vpop.f32.mrb[4].mxu0  ;;  %742 = vmatprep.mubr.f32.mxu0 %v422_v31 }
 0x101   :  { %v334_v36 = vpop.f32.mrb[4].mxu1  ;;  %887 = vmatprep.mubr.f32.mxu1 %v424_v33  ;;  %v175_v37 = vpop.f32.mrb[5].mxu0  ;;  %743 = vmatmul.mubr.f32.gmra.mrb[34].mxu0 %v421_v7  ;;  %v425_v40 = vmax.f32 %v173_v35, 0.0 }
 0x102   :  { %v426_v38 = vmax.f32 %v175_v37, 0.0  ;;  %v336_v39 = vpop.f32.mrb[5].mxu1  ;;  %888 = vmatmul.mubr.f32.gmra.mrb[34].mxu1 %v423_v34  ;;  %v427_v42 = vmax.f32 %v334_v36, 0.0 }
 0x103   :  { %v428_v41 = vmax.f32 %v336_v39, 0.0 }
 0x104   :  { %v179_v43 = vpop.f32.mrb[6].mxu0  ;;  %747 = vmatprep.mubr.f32.mxu0 %v426_v38 }
 0x105   :  { %v340_v44 = vpop.f32.mrb[6].mxu1  ;;  %892 = vmatprep.mubr.f32.mxu1 %v428_v41  ;;  %v181_v45 = vpop.f32.mrb[7].mxu0  ;;  %748 = vmatmul.mubr.f32.gmra.mrb[36].mxu0 %v425_v40  ;;  %v429_v48 = vmax.f32 %v179_v43, 0.0 }
 0x106   :  { %v430_v46 = vmax.f32 %v181_v45, 0.0  ;;  %v342_v47 = vpop.f32.mrb[7].mxu1  ;;  %893 = vmatmul.mubr.f32.gmra.mrb[36].mxu1 %v427_v42  ;;  %v431_v50 = vmax.f32 %v340_v44, 0.0 }
 0x107   :  { %v432_v49 = vmax.f32 %v342_v47, 0.0 }
 0x108   :  { %v185_v51 = vpop.f32.mrb[8].mxu0  ;;  %752 = vmatprep.mubr.f32.mxu0 %v430_v46 }
 0x109   :  { %v346_v52 = vpop.f32.mrb[8].mxu1  ;;  %897 = vmatprep.mubr.f32.mxu1 %v432_v49  ;;  %v187_v53 = vpop.f32.mrb[9].mxu0  ;;  %753 = vmatmul.mubr.f32.gmra.mrb[38].mxu0 %v429_v48  ;;  %v433_v56 = vmax.f32 %v185_v51, 0.0 }
 0x10a   :  { %v434_v54 = vmax.f32 %v187_v53, 0.0  ;;  %v348_v55 = vpop.f32.mrb[9].mxu1  ;;  %898 = vmatmul.mubr.f32.gmra.mrb[38].mxu1 %v431_v50  ;;  %v435_v58 = vmax.f32 %v346_v52, 0.0 }
 0x10b   :  { %v436_v57 = vmax.f32 %v348_v55, 0.0 }
 0x10c   :  { %v191_v59 = vpop.f32.mrb[10].mxu0  ;;  %757 = vmatprep.mubr.f32.mxu0 %v434_v54 }
 0x10d   :  { %v352_v60 = vpop.f32.mrb[10].mxu1  ;;  %902 = vmatprep.mubr.f32.mxu1 %v436_v57  ;;  %v193_v61 = vpop.f32.mrb[11].mxu0  ;;  %758 = vmatmul.mubr.f32.gmra.mrb[40].mxu0 %v433_v56  ;;  %v437_v0 = vmax.f32 %v191_v59, 0.0 }
 0x10e   :  { %v438_v62 = vmax.f32 %v193_v61, 0.0  ;;  %v354_v63 = vpop.f32.mrb[11].mxu1  ;;  %903 = vmatmul.mubr.f32.gmra.mrb[40].mxu1 %v435_v58  ;;  %v439_v2 = vmax.f32 %v352_v60, 0.0 }
 0x10f   :  { %v440_v1 = vmax.f32 %v354_v63, 0.0 }
 0x110   :  { %v197_v3 = vpop.f32.mrb[12].mxu0  ;;  %762 = vmatprep.mubr.f32.mxu0 %v438_v62 }
 0x111   :  { %v358_v4 = vpop.f32.mrb[12].mxu1  ;;  %907 = vmatprep.mubr.f32.mxu1 %v440_v1  ;;  %v199_v5 = vpop.f32.mrb[13].mxu0  ;;  %763 = vmatmul.mubr.f32.gmra.mrb[42].mxu0 %v437_v0  ;;  %v441_v9 = vmax.f32 %v197_v3, 0.0 }
 0x112   :  { %v442_v6 = vmax.f32 %v199_v5, 0.0  ;;  %v360_v8 = vpop.f32.mrb[13].mxu1  ;;  %908 = vmatmul.mubr.f32.gmra.mrb[42].mxu1 %v439_v2  ;;  %v443_v11 = vmax.f32 %v358_v4, 0.0 }
 0x113   :  { %v444_v10 = vmax.f32 %v360_v8, 0.0 }
 0x114   :  { %v203_v12 = vpop.f32.mrb[14].mxu0  ;;  %767 = vmatprep.mubr.f32.mxu0 %v442_v6 }
 0x115   :  { %v364_v13 = vpop.f32.mrb[14].mxu1  ;;  %912 = vmatprep.mubr.f32.mxu1 %v444_v10  ;;  %v205_v14 = vpop.f32.mrb[15].mxu0  ;;  %768 = vmatmul.mubr.f32.gmra.mrb[44].mxu0 %v441_v9  ;;  %v445_v17 = vmax.f32 %v203_v12, 0.0 }
 0x116   :  { %v446_v15 = vmax.f32 %v205_v14, 0.0  ;;  %v366_v16 = vpop.f32.mrb[15].mxu1  ;;  %913 = vmatmul.mubr.f32.gmra.mrb[44].mxu1 %v443_v11  ;;  %v447_v19 = vmax.f32 %v364_v13, 0.0 }
 0x117   :  { %v448_v18 = vmax.f32 %v366_v16, 0.0 }
 0x118   :  { %v209_v20 = vpop.f32.mrb[16].mxu0  ;;  %772 = vmatprep.mubr.f32.mxu0 %v446_v15 }
 0x119   :  { %v370_v21 = vpop.f32.mrb[16].mxu1  ;;  %917 = vmatprep.mubr.f32.mxu1 %v448_v18  ;;  %v211_v22 = vpop.f32.mrb[17].mxu0  ;;  %773 = vmatmul.mubr.f32.gmra.mrb[46].mxu0 %v445_v17  ;;  %v449_v25 = vmax.f32 %v209_v20, 0.0 }
 0x11a   :  { %v450_v23 = vmax.f32 %v211_v22, 0.0  ;;  %v372_v24 = vpop.f32.mrb[17].mxu1  ;;  %918 = vmatmul.mubr.f32.gmra.mrb[46].mxu1 %v447_v19  ;;  %v451_v27 = vmax.f32 %v370_v21, 0.0 }
 0x11b   :  { %v452_v26 = vmax.f32 %v372_v24, 0.0 }
 0x11c   :  { %v215_v28 = vpop.f32.mrb[18].mxu0  ;;  %777 = vmatprep.mubr.f32.mxu0 %v450_v23 }
 0x11d   :  { %v376_v29 = vpop.f32.mrb[18].mxu1  ;;  %922 = vmatprep.mubr.f32.mxu1 %v452_v26  ;;  %v217_v30 = vpop.f32.mrb[19].mxu0  ;;  %778 = vmatmul.mubr.f32.gmra.mrb[48].mxu0 %v449_v25  ;;  %v453_v7 = vmax.f32 %v215_v28, 0.0 }
 0x11e   :  { %v454_v31 = vmax.f32 %v217_v30, 0.0  ;;  %v378_v32 = vpop.f32.mrb[19].mxu1  ;;  %923 = vmatmul.mubr.f32.gmra.mrb[48].mxu1 %v451_v27  ;;  %v455_v34 = vmax.f32 %v376_v29, 0.0 }
 0x11f   :  { %v456_v33 = vmax.f32 %v378_v32, 0.0 }
 0x120   :  { %v221_v35 = vpop.f32.mrb[20].mxu0  ;;  %782 = vmatprep.mubr.f32.mxu0 %v454_v31 }
 0x121   :  { %v382_v36 = vpop.f32.mrb[20].mxu1  ;;  %927 = vmatprep.mubr.f32.mxu1 %v456_v33  ;;  %v223_v37 = vpop.f32.mrb[21].mxu0  ;;  %783 = vmatmul.mubr.f32.gmra.mrb[50].mxu0 %v453_v7  ;;  %v457_v40 = vmax.f32 %v221_v35, 0.0 }
 0x122   :  { %v458_v38 = vmax.f32 %v223_v37, 0.0  ;;  %v384_v39 = vpop.f32.mrb[21].mxu1  ;;  %928 = vmatmul.mubr.f32.gmra.mrb[50].mxu1 %v455_v34  ;;  %v459_v42 = vmax.f32 %v382_v36, 0.0 }
 0x123   :  { %v460_v41 = vmax.f32 %v384_v39, 0.0 }
 0x124   :  { %v227_v43 = vpop.f32.mrb[22].mxu0  ;;  %787 = vmatprep.mubr.f32.mxu0 %v458_v38 }
 0x125   :  { %v388_v44 = vpop.f32.mrb[22].mxu1  ;;  %932 = vmatprep.mubr.f32.mxu1 %v460_v41  ;;  %v229_v45 = vpop.f32.mrb[23].mxu0  ;;  %788 = vmatmul.mubr.f32.gmra.mrb[52].mxu0 %v457_v40  ;;  %v461_v48 = vmax.f32 %v227_v43, 0.0 }
 0x126   :  { %v462_v46 = vmax.f32 %v229_v45, 0.0  ;;  %v390_v47 = vpop.f32.mrb[23].mxu1  ;;  %933 = vmatmul.mubr.f32.gmra.mrb[52].mxu1 %v459_v42  ;;  %v463_v50 = vmax.f32 %v388_v44, 0.0 }
 0x127   :  { %v464_v49 = vmax.f32 %v390_v47, 0.0 }
 0x128   :  { %v233_v51 = vpop.f32.mrb[24].mxu0  ;;  %792 = vmatprep.mubr.f32.mxu0 %v462_v46 }
 0x129   :  { %v394_v52 = vpop.f32.mrb[24].mxu1  ;;  %937 = vmatprep.mubr.f32.mxu1 %v464_v49  ;;  %v235_v53 = vpop.f32.mrb[25].mxu0  ;;  %793 = vmatmul.mubr.f32.gmra.mrb[54].mxu0 %v461_v48  ;;  %v465_v56 = vmax.f32 %v233_v51, 0.0 }
 0x12a   :  { %v466_v54 = vmax.f32 %v235_v53, 0.0  ;;  %v396_v55 = vpop.f32.mrb[25].mxu1  ;;  %938 = vmatmul.mubr.f32.gmra.mrb[54].mxu1 %v463_v50  ;;  %v467_v58 = vmax.f32 %v394_v52, 0.0 }
 0x12b   :  { %v468_v57 = vmax.f32 %v396_v55, 0.0 }
 0x12c   :  { %v239_v59 = vpop.f32.mrb[26].mxu0  ;;  %797 = vmatprep.mubr.f32.mxu0 %v466_v54 }
 0x12d   :  { %v400_v60 = vpop.f32.mrb[26].mxu1  ;;  %942 = vmatprep.mubr.f32.mxu1 %v468_v57  ;;  %v241_v61 = vpop.f32.mrb[27].mxu0  ;;  %798 = vmatmul.mubr.f32.gmra.mrb[56].mxu0 %v465_v56  ;;  %v469_v0 = vmax.f32 %v239_v59, 0.0 }
 0x12e   :  { %v470_v62 = vmax.f32 %v241_v61, 0.0  ;;  %v402_v63 = vpop.f32.mrb[27].mxu1  ;;  %943 = vmatmul.mubr.f32.gmra.mrb[56].mxu1 %v467_v58  ;;  %v471_v2 = vmax.f32 %v400_v60, 0.0 }
 0x12f   :  { %v472_v1 = vmax.f32 %v402_v63, 0.0 }
 0x130   :  { %v245_v3 = vpop.f32.mrb[28].mxu0  ;;  %802 = vmatprep.mubr.f32.mxu0 %v470_v62 }
 0x131   :  { %v406_v4 = vpop.f32.mrb[28].mxu1  ;;  %947 = vmatprep.mubr.f32.mxu1 %v472_v1  ;;  %v247_v5 = vpop.f32.mrb[29].mxu0  ;;  %803 = vmatmul.mubr.f32.gmra.mrb[58].mxu0 %v469_v0  ;;  %v473_v9 = vmax.f32 %v245_v3, 0.0 }
 0x132   :  { %v474_v6 = vmax.f32 %v247_v5, 0.0  ;;  %v408_v8 = vpop.f32.mrb[29].mxu1  ;;  %948 = vmatmul.mubr.f32.gmra.mrb[58].mxu1 %v471_v2  ;;  %v475_v11 = vmax.f32 %v406_v4, 0.0 }
 0x133   :  { %v476_v10 = vmax.f32 %v408_v8, 0.0 }
 0x134   :  { %v251_v12 = vpop.f32.mrb[30].mxu0  ;;  %807 = vmatprep.mubr.f32.mxu0 %v474_v6 }
 0x135   :  { %v412_v13 = vpop.f32.mrb[30].mxu1  ;;  %952 = vmatprep.mubr.f32.mxu1 %v476_v10  ;;  %v253_v14 = vpop.f32.mrb[31].mxu0  ;;  %808 = vmatmul.mubr.f32.gmra.mrb[60].mxu0 %v473_v9  ;;  %v477_v17 = vmax.f32 %v251_v12, 0.0 }
 0x136   :  { %v478_v15 = vmax.f32 %v253_v14, 0.0  ;;  %v414_v16 = vpop.f32.mrb[31].mxu1  ;;  %953 = vmatmul.mubr.f32.gmra.mrb[60].mxu1 %v475_v11  ;;  %v479_v19 = vmax.f32 %v412_v13, 0.0 }
 0x137   :  { %v480_v18 = vmax.f32 %v414_v16, 0.0 }
 0x138   :  { %812 = vmatprep.mubr.f32.mxu0 %v478_v15 }
 0x139   :  { %957 = vmatprep.mubr.f32.mxu1 %v480_v18  ;;  %813 = vmatmul.mubr.f32.gmra.mrb[62].mxu0 %v477_v17 }
 0x13a   :  { %958 = vmatmul.mubr.f32.gmra.mrb[62].mxu1 %v479_v19 }
 0x1d0   :  { %v1043_v20 = vpop.f32.mrb[32].mxu0 }
 0x1d1   :  { %v1123_v21 = vpop.f32.mrb[32].mxu1  ;;  %v1044_v22 = vpop.f32.mrb[33].mxu0 }
 0x1d2   :  { %v1045_v23 = vadd.f32 %v1044_v22, %v1043_v20  ;;  %v1124_v24 = vpop.f32.mrb[33].mxu1 }
 0x1d3   :  { %v1125_v25 = vadd.f32 %v1124_v24, %v1123_v21 }
 0x1d4   :  { %v1046_v26 = vpop.f32.mrb[34].mxu0 }
 0x1d5   :  { %v885_v27 = vadd.f32 %v1125_v25, %v1045_v23  ;;  %v1126_v28 = vpop.f32.mrb[34].mxu1  ;;  %v1047_v29 = vpop.f32.mrb[35].mxu0 }
 0x1d6   :  { %v1048_v30 = vadd.f32 %v1047_v29, %v1046_v26  ;;  %v1127_v31 = vpop.f32.mrb[35].mxu1 }
 0x1d7   :  { %v963_v32 = vmax.f32 %v885_v27, 0.0  ;;  %v1128_v7 = vadd.f32 %v1127_v31, %v1126_v28 }
 0x1d8   :  { %v1049_v33 = vpop.f32.mrb[36].mxu0 }
 0x1d9   :  { %979 = vst [vmem:[#allocation3] sm:$0xff] %v963_v32  ;;  %v890_v34 = vadd.f32 %v1128_v7, %v1048_v30  ;;  %v1129_v35 = vpop.f32.mrb[36].mxu1  ;;  %v1050_v36 = vpop.f32.mrb[37].mxu0 }
 0x1da   :  { %v1051_v37 = vadd.f32 %v1050_v36, %v1049_v33  ;;  %v1130_v38 = vpop.f32.mrb[37].mxu1 }
 0x1db   :  { %v964_v39 = vmax.f32 %v890_v34, 0.0  ;;  %v1131_v40 = vadd.f32 %v1130_v38, %v1129_v35 }
 0x1dc   :  { %v1052_v41 = vpop.f32.mrb[38].mxu0 }
 0x1dd   :  { %980 = vst [vmem:[#allocation3 + $0x8] sm:$0xff] %v964_v39  ;;  %v895_v42 = vadd.f32 %v1131_v40, %v1051_v37  ;;  %v1132_v43 = vpop.f32.mrb[38].mxu1  ;;  %v1053_v44 = vpop.f32.mrb[39].mxu0 }
 0x1de   :  { %v1054_v45 = vadd.f32 %v1053_v44, %v1052_v41  ;;  %v1133_v46 = vpop.f32.mrb[39].mxu1 }
 0x1df   :  { %v965_v47 = vmax.f32 %v895_v42, 0.0  ;;  %v1134_v48 = vadd.f32 %v1133_v46, %v1132_v43 }
 0x1e0   :  { %v1055_v49 = vpop.f32.mrb[40].mxu0 }
 0x1e1   :  { %981 = vst [vmem:[#allocation3 + $0x10] sm:$0xff] %v965_v47  ;;  %v900_v50 = vadd.f32 %v1134_v48, %v1054_v45  ;;  %v1135_v51 = vpop.f32.mrb[40].mxu1  ;;  %v1056_v52 = vpop.f32.mrb[41].mxu0 }
 0x1e2   :  { %v1057_v53 = vadd.f32 %v1056_v52, %v1055_v49  ;;  %v1136_v54 = vpop.f32.mrb[41].mxu1 }
 0x1e3   :  { %v966_v55 = vmax.f32 %v900_v50, 0.0  ;;  %v1137_v56 = vadd.f32 %v1136_v54, %v1135_v51 }
 0x1e4   :  { %v1058_v57 = vpop.f32.mrb[42].mxu0 }
 0x1e5   :  { %982 = vst [vmem:[#allocation3 + $0x18] sm:$0xff] %v966_v55  ;;  %v905_v58 = vadd.f32 %v1137_v56, %v1057_v53  ;;  %v1138_v59 = vpop.f32.mrb[42].mxu1  ;;  %v1059_v60 = vpop.f32.mrb[43].mxu0 }
 0x1e6   :  { %v1060_v61 = vadd.f32 %v1059_v60, %v1058_v57  ;;  %v1139_v62 = vpop.f32.mrb[43].mxu1 }
 0x1e7   :  { %v967_v63 = vmax.f32 %v905_v58, 0.0  ;;  %v1140_v0 = vadd.f32 %v1139_v62, %v1138_v59 }
 0x1e8   :  { %v1061_v1 = vpop.f32.mrb[44].mxu0 }
 0x1e9   :  { %983 = vst [vmem:[#allocation3 + $0x20] sm:$0xff] %v967_v63  ;;  %v910_v2 = vadd.f32 %v1140_v0, %v1060_v61  ;;  %v1141_v3 = vpop.f32.mrb[44].mxu1  ;;  %v1062_v4 = vpop.f32.mrb[45].mxu0 }
 0x1ea   :  { %v1063_v5 = vadd.f32 %v1062_v4, %v1061_v1  ;;  %v1142_v6 = vpop.f32.mrb[45].mxu1 }
 0x1eb   :  { %v968_v8 = vmax.f32 %v910_v2, 0.0  ;;  %v1143_v9 = vadd.f32 %v1142_v6, %v1141_v3 }
 0x1ec   :  { %v1064_v10 = vpop.f32.mrb[46].mxu0 }
 0x1ed   :  { %984 = vst [vmem:[#allocation3 + $0x28] sm:$0xff] %v968_v8  ;;  %v915_v11 = vadd.f32 %v1143_v9, %v1063_v5  ;;  %v1144_v12 = vpop.f32.mrb[46].mxu1  ;;  %v1065_v13 = vpop.f32.mrb[47].mxu0 }
 0x1ee   :  { %v1066_v14 = vadd.f32 %v1065_v13, %v1064_v10  ;;  %v1145_v15 = vpop.f32.mrb[47].mxu1 }
 0x1ef   :  { %v969_v16 = vmax.f32 %v915_v11, 0.0  ;;  %v1146_v17 = vadd.f32 %v1145_v15, %v1144_v12 }
 0x1f0   :  { %v1067_v18 = vpop.f32.mrb[48].mxu0 }
 0x1f1   :  { %985 = vst [vmem:[#allocation3 + $0x30] sm:$0xff] %v969_v16  ;;  %v920_v19 = vadd.f32 %v1146_v17, %v1066_v14  ;;  %v1147_v20 = vpop.f32.mrb[48].mxu1  ;;  %v1068_v21 = vpop.f32.mrb[49].mxu0 }
 0x1f2   :  { %v1069_v22 = vadd.f32 %v1068_v21, %v1067_v18  ;;  %v1148_v23 = vpop.f32.mrb[49].mxu1 }
 0x1f3   :  { %v970_v24 = vmax.f32 %v920_v19, 0.0  ;;  %v1149_v25 = vadd.f32 %v1148_v23, %v1147_v20 }
 0x1f4   :  { %v1070_v26 = vpop.f32.mrb[50].mxu0 }
 0x1f5   :  { %986 = vst [vmem:[#allocation3 + $0x38] sm:$0xff] %v970_v24  ;;  %v925_v27 = vadd.f32 %v1149_v25, %v1069_v22  ;;  %v1150_v28 = vpop.f32.mrb[50].mxu1  ;;  %v1071_v29 = vpop.f32.mrb[51].mxu0 }
 0x1f6   :  { %v1072_v30 = vadd.f32 %v1071_v29, %v1070_v26  ;;  %v1151_v31 = vpop.f32.mrb[51].mxu1 }
 0x1f7   :  { %v971_v32 = vmax.f32 %v925_v27, 0.0  ;;  %v1152_v7 = vadd.f32 %v1151_v31, %v1150_v28 }
 0x1f8   :  { %v1073_v33 = vpop.f32.mrb[52].mxu0 }
 0x1f9   :  { %987 = vst [vmem:[#allocation3 + $0x40] sm:$0xff] %v971_v32  ;;  %v930_v34 = vadd.f32 %v1152_v7, %v1072_v30  ;;  %v1153_v35 = vpop.f32.mrb[52].mxu1  ;;  %v1074_v36 = vpop.f32.mrb[53].mxu0 }
 0x1fa   :  { %v1075_v37 = vadd.f32 %v1074_v36, %v1073_v33  ;;  %v1154_v38 = vpop.f32.mrb[53].mxu1 }
 0x1fb   :  { %v972_v39 = vmax.f32 %v930_v34, 0.0  ;;  %v1155_v40 = vadd.f32 %v1154_v38, %v1153_v35 }
 0x1fc   :  { %v1076_v41 = vpop.f32.mrb[54].mxu0 }
 0x1fd   :  { %988 = vst [vmem:[#allocation3 + $0x48] sm:$0xff] %v972_v39  ;;  %v935_v42 = vadd.f32 %v1155_v40, %v1075_v37  ;;  %v1156_v43 = vpop.f32.mrb[54].mxu1  ;;  %v1077_v44 = vpop.f32.mrb[55].mxu0 }
 0x1fe   :  { %v1078_v45 = vadd.f32 %v1077_v44, %v1076_v41  ;;  %v1157_v46 = vpop.f32.mrb[55].mxu1 }
 0x1ff   :  { %v973_v47 = vmax.f32 %v935_v42, 0.0  ;;  %v1158_v48 = vadd.f32 %v1157_v46, %v1156_v43 }
 0x200   :  { %v1079_v49 = vpop.f32.mrb[56].mxu0 }
 0x201   :  { %989 = vst [vmem:[#allocation3 + $0x50] sm:$0xff] %v973_v47  ;;  %v940_v50 = vadd.f32 %v1158_v48, %v1078_v45  ;;  %v1159_v51 = vpop.f32.mrb[56].mxu1  ;;  %v1080_v52 = vpop.f32.mrb[57].mxu0 }
 0x202   :  { %v1081_v53 = vadd.f32 %v1080_v52, %v1079_v49  ;;  %v1160_v54 = vpop.f32.mrb[57].mxu1 }
 0x203   :  { %v974_v55 = vmax.f32 %v940_v50, 0.0  ;;  %v1161_v56 = vadd.f32 %v1160_v54, %v1159_v51 }
 0x204   :  { %v1082_v57 = vpop.f32.mrb[58].mxu0 }
 0x205   :  { %990 = vst [vmem:[#allocation3 + $0x58] sm:$0xff] %v974_v55  ;;  %v945_v58 = vadd.f32 %v1161_v56, %v1081_v53  ;;  %v1162_v59 = vpop.f32.mrb[58].mxu1  ;;  %v1083_v60 = vpop.f32.mrb[59].mxu0 }
 0x206   :  { %v1084_v61 = vadd.f32 %v1083_v60, %v1082_v57  ;;  %v1163_v62 = vpop.f32.mrb[59].mxu1 }
 0x207   :  { %v975_v63 = vmax.f32 %v945_v58, 0.0  ;;  %v1164_v0 = vadd.f32 %v1163_v62, %v1162_v59 }
 0x208   :  { %v1085_v1 = vpop.f32.mrb[60].mxu0 }
 0x209   :  { %991 = vst [vmem:[#allocation3 + $0x60] sm:$0xff] %v975_v63  ;;  %v950_v2 = vadd.f32 %v1164_v0, %v1084_v61  ;;  %v1165_v3 = vpop.f32.mrb[60].mxu1  ;;  %v1086_v4 = vpop.f32.mrb[61].mxu0 }
 0x20a   :  { %v1087_v5 = vadd.f32 %v1086_v4, %v1085_v1  ;;  %v1166_v6 = vpop.f32.mrb[61].mxu1 }
 0x20b   :  { %v976_v8 = vmax.f32 %v950_v2, 0.0  ;;  %v1167_v9 = vadd.f32 %v1166_v6, %v1165_v3 }
 0x20c   :  { %v1088_v10 = vpop.f32.mrb[62].mxu0 }
 0x20d   :  { %992 = vst [vmem:[#allocation3 + $0x68] sm:$0xff] %v976_v8  ;;  %v955_v11 = vadd.f32 %v1167_v9, %v1087_v5  ;;  %v1168_v12 = vpop.f32.mrb[62].mxu1  ;;  %v1089_v13 = vpop.f32.mrb[63].mxu0 }
 0x20e   :  { %v1090_v14 = vadd.f32 %v1089_v13, %v1088_v10  ;;  %v1169_v15 = vpop.f32.mrb[63].mxu1 }
 0x20f   :  { %v977_v16 = vmax.f32 %v955_v11, 0.0  ;;  %v1170_v17 = vadd.f32 %v1169_v15, %v1168_v12 }
 0x211   :  { %993 = vst [vmem:[#allocation3 + $0x70] sm:$0xff] %v977_v16  ;;  %v960_v18 = vadd.f32 %v1170_v17, %v1090_v14 }
 0x213   :  { %v978_v19 = vmax.f32 %v960_v18, 0.0 }
 0x215   :  { %994 = vst [vmem:[#allocation3 + $0x78] sm:$0xff] %v978_v19 }
 0x216   :  { %1314 = shalt.err (!%p1311_p4)
}
 0x217   :  { %s1315_s27 = scalar_lea.hbm %s1830_s3, 2048 }
 0x218   :  { %p1316_p5 = scmp.ne.s32.totalorder %s1830_s3, %s1315_s27  ;;  %p1319_p6 = scmp.lt.u32.totalorder %s1315_s27, %s1830_s3 }
 0x21a   :  { %p1321_p7 = pnand %p1319_p6, %p1316_p5 }
 0x21c   :  { %1324 = shalt.err (!%p1321_p7)
}
 0x21d   :  { %s1329_s5 = smov 128   ;;  %s1330_s6 = smov 8  }
 0x21e   :  { %1006 = dma.vmem_to_hbm [thread:$0]  %s1001_s23, 2048, %s1830_s3, [#allocation4], %s1329_s5, %s1329_s5, %s1330_s6  }
 0x21f   :  { %1325 = dma.done.wait [#allocation4], 2048  }
 0x220   :  { %1326 = vsyncadd [#allocation4], 4294965248 }
 0x221   :  { %1010 = vsyncpa [#allocation4], 1 }

</bundles_post_ra>
